<compile_context>
chip_gen: v5e
topology: v5e:2x2
jax: 0.10.0
libtpu: 0.0.40
codegen_flags: <defaults>
</compile_context>

<pallas_src>
import functools

import jax
import jax.numpy as jnp
from jax.experimental import pallas as pl
from jax.experimental.pallas import tpu as pltpu

# --- small config consistent with the module ---
BATCH = 2
SEQ = 8
HIDDEN = 32
LN_EPS = 1e-5


def pack_params(params):
    """One lane-contiguous param slab: rows [0:H) = W, H = bias, H+1 = gamma, H+2 = beta, pad to x8."""
    H = params["wo"].shape[0]
    pad_rows = (-(H + 3)) % 8
    return jnp.concatenate(
        [params["wo"], params["bo"], params["gamma"], params["beta"],
         jnp.zeros((pad_rows, H), jnp.float32)],
        axis=0,
    )  # (40, H) for H=32


def _self_output_kernel(h_ref, x_ref, p_ref, o_ref, *, H):
    h = h_ref[...]                      # (M, H) hidden_states (dense input)
    x = x_ref[...]                      # (M, H) input_tensor (residual)
    w = p_ref[0:H, :]                   # (H, H) dense weight (used as h @ w)
    b = p_ref[H:H + 1, :]               # (1, H) dense bias
    gamma = p_ref[H + 1:H + 2, :]       # (1, H) LayerNorm weight
    beta = p_ref[H + 2:H + 3, :]        # (1, H) LayerNorm bias

    # Dense: bf16 MXU operands, f32 accumulation.
    y = jnp.dot(h.astype(jnp.bfloat16), w.astype(jnp.bfloat16),
                preferred_element_type=jnp.float32) + b
    # hidden dropout: identity (eval mode)
    y = y + x                            # residual

    # BertLayerNorm (biased variance, eps inside the sqrt), all in f32.
    u = jnp.mean(y, axis=-1, keepdims=True)
    var = jnp.mean((y - u) ** 2, axis=-1, keepdims=True)
    o_ref[...] = gamma * ((y - u) * jax.lax.rsqrt(var + LN_EPS)) + beta


@jax.jit
def bert_self_output(hidden_states, input_tensor, param_slab):
    """hidden_states, input_tensor: (B, S, H) f32; param_slab: packed (>=H+3, H) f32."""
    B, S, H = hidden_states.shape
    M = B * S
    h2 = hidden_states.reshape(M, H)
    x2 = input_tensor.reshape(M, H)

    cost = pl.CostEstimate(
        flops=2 * M * H * H + 8 * M * H,
        transcendentals=M,
        bytes_accessed=4 * (2 * M * H + int(param_slab.size) + M * H),
    )
    kernel = functools.partial(_self_output_kernel, H=H)
    out2 = pl.pallas_call(
        kernel,
        out_shape=jax.ShapeDtypeStruct((M, H), jnp.float32),
        in_specs=[pl.BlockSpec(memory_space=pltpu.MemorySpace.VMEM)] * 3,
        out_specs=pl.BlockSpec(memory_space=pltpu.MemorySpace.VMEM),
        cost_estimate=cost,
        compiler_params=pltpu.CompilerParams(vmem_limit_bytes=16 * 1024 * 1024),
    )(h2, x2, param_slab)
    return out2.reshape(B, S, H)


def init_params(key):
    ks = jax.random.split(key, 2)
    std = 0.02
    return {
        "wo": std * jax.random.normal(ks[0], (HIDDEN, HIDDEN), jnp.float32),
        "bo": std * jax.random.normal(ks[1], (1, HIDDEN), jnp.float32),
        "gamma": jnp.ones((1, HIDDEN), jnp.float32),
        "beta": jnp.zeros((1, HIDDEN), jnp.float32),
    }


def reference(hidden_states, input_tensor, params):
    y = hidden_states @ params["wo"] + params["bo"]
    y = y + input_tensor
    u = jnp.mean(y, axis=-1, keepdims=True)
    s = jnp.mean((y - u) ** 2, axis=-1, keepdims=True)
    return params["gamma"] * ((y - u) / jnp.sqrt(s + LN_EPS)) + params["beta"]


if __name__ == "__main__":
    key = jax.random.PRNGKey(0)
    k_h, k_x, k_p = jax.random.split(key, 3)

    hidden_states = jax.random.normal(k_h, (BATCH, SEQ, HIDDEN), jnp.float32)
    input_tensor = jax.random.normal(k_x, (BATCH, SEQ, HIDDEN), jnp.float32)

    params = init_params(k_p)
    param_slab = pack_params(params)   # fused once at init time, not per call

    out = bert_self_output(hidden_states, input_tensor, param_slab)
    jax.block_until_ready(out)
    assert out.shape == (BATCH, SEQ, HIDDEN)

    ref = reference(hidden_states, input_tensor, params)
    max_err = float(jnp.max(jnp.abs(out - ref)))
    assert jnp.allclose(out, ref, rtol=2e-2, atol=2e-2), max_err
    print("KERNEL_OK")
</pallas_src>

<mosaic_0001>
module attributes {stable_mosaic.version = 11 : i64} {
  func.func @_self_output_kernel(%arg0: memref<16x32xf32, #tpu.memory_space<vmem>>, %arg1: memref<16x32xf32, #tpu.memory_space<vmem>>, %arg2: memref<40x32xf32, #tpu.memory_space<vmem>>, %arg3: memref<16x32xf32, #tpu.memory_space<vmem>>) attributes {dimension_semantics = [], scalar_prefetch = 0 : i64, scratch_operands = 0 : i64, tpu.core_type = #tpu.core_type<tc>} {
    %c0 = arith.constant 0 : index
    %c0_0 = arith.constant 0 : index
    %0 = vector.load %arg0[%c0, %c0_0] : memref<16x32xf32, #tpu.memory_space<vmem>>, vector<16x32xf32>
    %c0_1 = arith.constant 0 : index
    %c0_2 = arith.constant 0 : index
    %1 = vector.load %arg1[%c0_1, %c0_2] : memref<16x32xf32, #tpu.memory_space<vmem>>, vector<16x32xf32>
    %c0_3 = arith.constant 0 : index
    %c0_4 = arith.constant 0 : index
    %2 = vector.load %arg2[%c0_3, %c0_4] : memref<40x32xf32, #tpu.memory_space<vmem>>, vector<32x32xf32>
    %c32 = arith.constant 32 : index
    %c0_5 = arith.constant 0 : index
    %3 = vector.load %arg2[%c32, %c0_5] : memref<40x32xf32, #tpu.memory_space<vmem>>, vector<1x32xf32>
    %c33 = arith.constant 33 : index
    %c0_6 = arith.constant 0 : index
    %4 = vector.load %arg2[%c33, %c0_6] : memref<40x32xf32, #tpu.memory_space<vmem>>, vector<1x32xf32>
    %c34 = arith.constant 34 : index
    %c0_7 = arith.constant 0 : index
    %5 = vector.load %arg2[%c34, %c0_7] : memref<40x32xf32, #tpu.memory_space<vmem>>, vector<1x32xf32>
    %6 = arith.truncf %0 : vector<16x32xf32> to vector<16x32xbf16>
    %7 = arith.truncf %2 : vector<32x32xf32> to vector<32x32xbf16>
    %cst = arith.constant dense<0.000000e+00> : vector<16x32xf32>
    %8 = tpu.matmul %6, %7, %cst {dimension_numbers = #tpu.dot_dimension_numbers<[1], [0], [0], [1], [0, 0, 1, 1], [], []>} : vector<16x32xbf16>, vector<32x32xbf16>, vector<16x32xf32> -> vector<16x32xf32>
    %9 = vector.broadcast %3 : vector<1x32xf32> to vector<16x32xf32>
    %10 = arith.addf %8, %9 : vector<16x32xf32>
    %11 = arith.addf %10, %1 : vector<16x32xf32>
    %cst_8 = arith.constant dense<0.000000e+00> : vector<16xf32>
    %12 = vector.multi_reduction <add>, %11, %cst_8 [1] : vector<16x32xf32> to vector<16xf32>
    %13 = vector.shape_cast %12 : vector<16xf32> to vector<16x1xf32>
    %cst_9 = arith.constant 3.200000e+01 : f32
    %14 = vector.broadcast %cst_9 : f32 to vector<16x1xf32>
    %15 = arith.divf %13, %14 : vector<16x1xf32>
    %16 = vector.broadcast %15 : vector<16x1xf32> to vector<16x32xf32>
    %17 = arith.subf %11, %16 : vector<16x32xf32>
    %18 = arith.mulf %17, %17 : vector<16x32xf32>
    %cst_10 = arith.constant dense<0.000000e+00> : vector<16xf32>
    %19 = vector.multi_reduction <add>, %18, %cst_10 [1] : vector<16x32xf32> to vector<16xf32>
    %20 = vector.shape_cast %19 : vector<16xf32> to vector<16x1xf32>
    %cst_11 = arith.constant 3.200000e+01 : f32
    %21 = vector.broadcast %cst_11 : f32 to vector<16x1xf32>
    %22 = arith.divf %20, %21 : vector<16x1xf32>
    %23 = vector.broadcast %15 : vector<16x1xf32> to vector<16x32xf32>
    %24 = arith.subf %11, %23 : vector<16x32xf32>
    %cst_12 = arith.constant 9.99999974E-6 : f32
    %25 = vector.broadcast %cst_12 : f32 to vector<16x1xf32>
    %26 = arith.addf %22, %25 : vector<16x1xf32>
    %27 = math.rsqrt %26 : vector<16x1xf32>
    %28 = vector.broadcast %27 : vector<16x1xf32> to vector<16x32xf32>
    %29 = arith.mulf %24, %28 : vector<16x32xf32>
    %30 = vector.broadcast %4 : vector<1x32xf32> to vector<16x32xf32>
    %31 = arith.mulf %30, %29 : vector<16x32xf32>
    %32 = vector.broadcast %5 : vector<1x32xf32> to vector<16x32xf32>
    %33 = arith.addf %31, %32 : vector<16x32xf32>
    %c0_13 = arith.constant 0 : index
    %c0_14 = arith.constant 0 : index
    %34 = vector.load %arg3[%c0_13, %c0_14] : memref<16x32xf32, #tpu.memory_space<vmem>>, vector<16x32xf32>
    tpu.vector_store %arg3[%c0_13, %c0_14], %33 {strides = array<i32>} : memref<16x32xf32, #tpu.memory_space<vmem>>, vector<16x32xf32>,
    return
  }
}

</mosaic_0001>

<bundles_post_ra>
// kernel: bert_self_output.1
= control target key start
LH: loop header
LB: loop body
LE: loop exit
PB: predicated region body
PF: predicated region fallthrough
CT: control target
= control target key end

     0   :  { %s235_s0 = inlined_call_operand.vmem [shape: f32[16,32], index: 0, kind: input, shape index: {}]   ;;  %s236_s1 = inlined_call_operand.vmem [shape: f32[16,32], index: 1, kind: input, shape index: {}]   ;;  %s237_s2 = inlined_call_operand.vmem [shape: f32[40,32], index: 2, kind: input, shape index: {}]   ;;  %s238_s3 = inlined_call_operand.hbm [shape: f32[16,32], index: 3, kind: output, shape index: {}]  }
   0x1   :  { %v22_v0 = vld [vmem:[%s237_s2 + $0x10] sm:$0xff]  ;;  %v23_v1 = vld [vmem:[%s237_s2 + $0x18] sm:$0xff]  ;;  %v20_v2 = vld [vmem:[%s237_s2] sm:$0xff] }
   0x2   :  { %v29_v3 = vpack.c.bf16 %v23_v1, %v22_v0  ;;  %v21_v4 = vld [vmem:[%s237_s2 + $0x8] sm:$0xff]  ;;  %v16_v5 = vld [vmem:[%s235_s0] sm:$0xff] }
   0x3   :  { %v28_v6 = vpack.c.bf16 %v21_v4, %v20_v2  ;;  %v17_v7 = vld [vmem:[%s235_s0 + $0x8] sm:$0xff] }
   0x4   :  { %41 = vmatpush.bf16.msra.mxu0 %v29_v3 }
   0x5   :  { %8 = vsyncpa [#allocation3], 0  ;;  %v27_v8 = vpack.c.bf16 %v17_v7, %v16_v5  ;;  %vm31_vm0 = vcmask 261120   ;;  %v133_v9 = vld [vmem:[%s237_s2 + $0x20] ss:$0 sm:$0xff]  ;;  %v19_v16 = vld [vmem:[%s236_s1 + $0x8] sm:$0xff] }
   0x6   :  { %v18_v11 = vld [vmem:[%s236_s1] sm:$0xff]  ;;  %v168_v20 = vmov 32.0   ;;  %s169_s5 = smov [#allocation2]   ;;  %s116_s9 = sshll.u32 %s238_s3, 4  ;;  %s117_s9 = int_to_ptr.hbm [resolvable:$true] %s116_s9 }
   0x7   :  { %136 = vrcp.f32 %v168_v20  ;;  %v134_v51 = vld [vmem:[%s237_s2 + $0x21] ss:$0 sm:$0xff]  ;;  %v135_v55 = vld [vmem:[%s237_s2 + $0x22] ss:$0 sm:$0xff]  ;;  %s114_s6 = sshll.u32 %s169_s5, 4  ;;  %s170_s2 = smov 128   ;;  %s115_s6 = int_to_ptr.vmem [resolvable:$true] %s114_s6 }
   0x8   :  { %42 = vmatpush.bf16.msra.mxu0 %v28_v6  ;;  %s171_s10 = smov 8  }
   0xb   :  { %128 = vmatmul.msk.bf16.vlgmr.msra.gmra.mxu0 %vm31_vm0, %v27_v8 }
   0xd   :  { %v137_v21 = vpop.eup %136 }
   0xe   :  { %v58_v22 = vmul.f32 32.0, %v137_v21  ;;  %vm62_vm1 = vweird.f32 %v137_v21 }
  0x10   :  { %v59_v23 = vsub.f32 1.0, %v58_v22 }
  0x12   :  { %v60_v24 = vmul.f32 %v137_v21, %v59_v23 }
  0x14   :  { %v61_v25 = vadd.f32 %v137_v21, %v60_v24 }
  0x16   :  { %v63_v26 = vsel %vm62_vm1, %v137_v21, %v61_v25 }
  0x88   :  { %v44_v10 = vpop.f32.mrf.mxu0 }
  0x89   :  { %v45_v12 = vadd.f32 %v133_v9, %v44_v10 }
  0x8b   :  { %v49_v13 = vadd.f32 %v45_v12, %v18_v11 }
  0x8d   :  { %v51_v14 = vsel %vm31_vm0, %v49_v13, 0.0 }
  0x8e   :  { %52 = vadd.xlane.f32.xlu0 %v51_v14 }
  0x90   :  { %v46_v15 = vpop.f32.mrf.mxu0 }
  0x91   :  { %v47_v17 = vadd.f32 %v133_v9, %v46_v15 }
  0x93   :  { %v50_v18 = vadd.f32 %v47_v17, %v19_v16 }
  0x95   :  { %v54_v19 = vsel %vm31_vm0, %v50_v18, 0.0 }
  0x96   :  { %55 = vadd.xlane.f32.xlu0 %v54_v19 }
 0x101   :  { %v53_v27 = vpop.xlane.xlu0 %52 }
 0x102   :  { %v64_v28 = vmul.f32 %v63_v26, %v53_v27 }
 0x104   :  { %v66_v29 = vsub.f32 %v49_v13, %v64_v28 }
 0x106   :  { %v68_v30 = vmul.f32 %v66_v29, %v66_v29 }
 0x108   :  { %v70_v31 = vsel %vm31_vm0, %v68_v30, 0.0 }
 0x109   :  { %71 = vadd.xlane.f32.xlu1 %v70_v31  ;;  %v56_v32 = vpop.xlane.xlu0 %55 }
 0x10a   :  { %v65_v33 = vmul.f32 %v63_v26, %v56_v32 }
 0x10c   :  { %v67_v34 = vsub.f32 %v50_v18, %v65_v33 }
 0x10e   :  { %v69_v35 = vmul.f32 %v67_v34, %v67_v34 }
 0x110   :  { %v73_v36 = vsel %vm31_vm0, %v69_v35, 0.0 }
 0x111   :  { %74 = vadd.xlane.f32.xlu1 %v73_v36 }
 0x17c   :  { %v72_v37 = vpop.xlane.xlu1 %71 }
 0x17d   :  { %v76_v38 = vmul.f32 %v72_v37, %v63_v26 }
 0x17f   :  { %v78_v39 = vadd.f32 1e-05, %v76_v38 }
 0x181   :  { %138 = vrsqrt.f32 %v78_v39  ;;  %vm86_vm3 = vweird.f32 %v78_v39 }
 0x184   :  { %v75_v40 = vpop.xlane.xlu1 %74 }
 0x185   :  { %v77_v41 = vmul.f32 %v75_v40, %v63_v26 }
 0x187   :  { %v139_v42 = vpop.eup %138  ;;  %v79_v43 = vadd.f32 1e-05, %v77_v41 }
 0x188   :  { %v81_v44 = vmul.f32 %v139_v42, %v78_v39  ;;  %vm87_vm2 = vweird.f32 %v139_v42 }
 0x189   :  { %140 = vrsqrt.f32 %v79_v43  ;;  %vm88_vm4 = vmor %vm86_vm3, %vm87_vm2  ;;  %vm96_vm6 = vweird.f32 %v79_v43 }
 0x18a   :  { %v82_v45 = vmul.f32 %v139_v42, %v81_v44 }
 0x18c   :  { %v83_v46 = vmul.f32 0.5, %v82_v45 }
 0x18e   :  { %v84_v47 = vsub.f32 1.5, %v83_v46 }
 0x18f   :  { %v141_v48 = vpop.eup %140 }
 0x190   :  { %v85_v49 = vmul.f32 %v139_v42, %v84_v47  ;;  %v91_v50 = vmul.f32 %v141_v48, %v79_v43  ;;  %vm97_vm5 = vweird.f32 %v141_v48 }
 0x191   :  { %vm98_vm7 = vmor %vm96_vm6, %vm97_vm5 }
 0x192   :  { %v89_v52 = vsel %vm88_vm4, %v139_v42, %v85_v49  ;;  %v92_v53 = vmul.f32 %v141_v48, %v91_v50 }
 0x193   :  { %v100_v54 = vmul.f32 %v89_v52, %v66_v29 }
 0x194   :  { %v93_v56 = vmul.f32 0.5, %v92_v53 }
 0x195   :  { %v103_v57 = vmul.f32 %v134_v51, %v100_v54 }
 0x196   :  { %v94_v58 = vsub.f32 1.5, %v93_v56 }
 0x197   :  { %v106_v59 = vadd.f32 %v135_v55, %v103_v57 }
 0x198   :  { %v95_v60 = vmul.f32 %v141_v48, %v94_v58 }
 0x199   :  { %108 = vst.msk [vmem:[#allocation2] sm:$0xff] %vm31_vm0, %v106_v59 }
 0x19a   :  { %v99_v61 = vsel %vm98_vm7, %v141_v48, %v95_v60 }
 0x19b   :  { %v101_v62 = vmul.f32 %v99_v61, %v67_v34 }
 0x19d   :  { %v104_v63 = vmul.f32 %v134_v51, %v101_v62 }
 0x19f   :  { %v107_v0 = vadd.f32 %v135_v55, %v104_v63 }
 0x1a1   :  { %109 = vst.msk [vmem:[#allocation2 + $0x8] sm:$0xff] %vm31_vm0, %v107_v0 }
 0x1a2   :  { %122 = dma.vmem_to_hbm [thread:$0]  %s115_s6, 256, %s117_s9, [#allocation3], %s170_s2, %s170_s2, %s171_s10  }
 0x1a3   :  { %166 = dma.done.wait [#allocation3], 256  }
 0x1a4   :  { %167 = vsyncadd [#allocation3], 4294967040 }
 0x1a5   :  { %127 = vsyncpa [#allocation3], 1 }

</bundles_post_ra>
